<compile_context>
chip_gen: v7x
topology: tpu7x:2x2x1
jax: 0.10.0
libtpu: 0.0.40
codegen_flags: <defaults>
</compile_context>

<pallas_src>
import math
import functools

import jax
import jax.numpy as jnp
from jax.experimental import pallas as pl
from jax.experimental.pallas import tpu as pltpu


def _apply_act(y, act):
    if act == "relu":
        return jnp.maximum(y, 0.0)
    if act == "sigmoid":
        return jax.nn.sigmoid(y)
    if act == "paper_sigmoid":
        return 1.0 + jnp.tanh(y)
    if act == "tanh":
        return jnp.tanh(y)
    if act == "sin":
        return jnp.sin(y)
    return y


def _mlp_fused_kernel(*refs, l, d, act, bn, use_bias, eps, compute_dtype):
    """Whole network in a single invocation.  Activations live in the (aliased)
    output block; all l (padded, pre-transposed) weights are resident in VMEM."""
    if use_bias:
        x_ref, w_ref, b_ref, o_ref = refs
    else:
        x_ref, w_ref, o_ref = refs
        b_ref = None

    h0 = x_ref[...].astype(jnp.float32)             # (B, d_pad)

    def layer_body(i, h):
        w = w_ref[i]                                 # (d_pad, d_pad), (in, out) layout
        # nn.Linear: y = x @ W.T  ==  h @ w_t   (w_t pre-transposed on the host)
        y = jnp.dot(h.astype(compute_dtype), w,
                    preferred_element_type=jnp.float32)
        if use_bias:
            y = y + b_ref[i].astype(jnp.float32)[None, :]
        y = _apply_act(y, act)
        if bn:
            # u_j = sum_i y_ij^2 + eps ; y[:, j] *= 1/sqrt(u_j) ; then /sqrt(d)
            # fold the 1/sqrt(d) into the rsqrt: y/sqrt(u)/sqrt(d) == y*rsqrt(u*d)
            u = jnp.sum(y * y, axis=0, keepdims=True) + eps
            y = y * jax.lax.rsqrt(u * jnp.float32(d))
        return y

    h = jax.lax.fori_loop(0, l, layer_body, h0, unroll=True)
    o_ref[...] = h.astype(o_ref.dtype)


def mlp_forward(x, weights, biases=None, *, act=None, bn=False, eps=1e-6,
                compute_dtype=jnp.float32):
    """Pallas implementation of MLP.forward (no input/output projection).

    x:        (B, d)     float
    weights:  (l, d, d)  PyTorch nn.Linear layout (out_features, in_features)
    biases:   (l, d) or None
    compute_dtype: dtype fed to the MXU (jnp.float32 or jnp.bfloat16);
                   accumulation / activations / BN stay in f32.
    """
    B, d = x.shape
    l, d_out, d_in = weights.shape
    assert d_out == d and d_in == d, "hidden layers must be (l, d, d)"
    use_bias = biases is not None

    # Lane-pad the feature dim to a multiple of 128 (dense vregs, unmasked vst).
    d_pad = ((d + 127) // 128) * 128
    pad = d_pad - d

    # Pre-transpose to (l, d_in, d_out) so the kernel computes h @ w (no .T).
    w_t = jnp.swapaxes(weights, 1, 2)
    if pad:
        w_t = jnp.pad(w_t, ((0, 0), (0, pad), (0, pad)))
    w_t = w_t.astype(compute_dtype)

    # Fresh f32 copy of the activations (this buffer is aliased into the output).
    x_p = jnp.array(x, dtype=jnp.float32)
    if pad:
        x_p = jnp.pad(x_p, ((0, 0), (0, pad)))

    inputs = [x_p, w_t]
    if use_bias:
        b_p = biases.astype(jnp.float32)
        if pad:
            b_p = jnp.pad(b_p, ((0, 0), (0, pad)))
        inputs.append(b_p)

    # VMEM sanity: everything (activations in+out, weights, bias) is resident.
    resident_bytes = (2 * B * d_pad * 4
                      + w_t.size * w_t.dtype.itemsize
                      + (l * d_pad * 4 if use_bias else 0))
    # TODO(synk): for large l*d*d that does not fit VMEM, switch to a
    # layer/output-feature tiled grid (weight BlockSpec (1, d, tn)) instead of
    # this fully-fused kernel.
    assert resident_bytes <= 16 * 1024 * 1024, (
        f"fused MLP kernel needs {resident_bytes} B of VMEM; use the tiled path")

    kernel = functools.partial(
        _mlp_fused_kernel, l=l, d=d, act=act, bn=bn, use_bias=use_bias,
        eps=eps, compute_dtype=compute_dtype)

    vmem_spec = pl.BlockSpec(memory_space=pltpu.MemorySpace.VMEM)
    out = pl.pallas_call(
        kernel,
        out_shape=jax.ShapeDtypeStruct((B, d_pad), jnp.float32),
        in_specs=[vmem_spec] * len(inputs),
        out_specs=vmem_spec,
        input_output_aliases={0: 0},   # activations start life in the output buffer
    )(*inputs)

    return out[:, :d].astype(x.dtype)


def mlp_reference(x, weights, biases=None, *, act=None, bn=False, eps=1e-6):
    """Pure-JAX reference mirroring the PyTorch forward exactly."""
    h = x.astype(jnp.float32)
    d = x.shape[1]
    use_bias = biases is not None
    for i in range(weights.shape[0]):
        h = jnp.dot(h, weights[i].T, precision=jax.lax.Precision.HIGHEST)
        if use_bias:
            h = h + biases[i][None, :]
        h = _apply_act(h, act)
        if bn:
            u = jnp.sum(h * h, axis=0, keepdims=True) + eps
            h = h / jnp.sqrt(u)
            h = h / math.sqrt(d)
    return h


if __name__ == "__main__":
    # MLP(d=32, l=4) with the paper's configurations.
    B, d, l = 8, 32, 4

    key = jax.random.PRNGKey(0)
    kx, kw, kb = jax.random.split(key, 3)

    # Deterministic xavier_uniform with gain=calculate_gain('relu')=sqrt(2),
    # matching MLP.__init_layer default ('xavier').
    bound = math.sqrt(2.0) * math.sqrt(6.0 / (d + d))
    x = jax.random.normal(kx, (B, d), dtype=jnp.float32)
    weights = jax.random.uniform(kw, (l, d, d), minval=-bound, maxval=bound,
                                 dtype=jnp.float32)
    biases = jax.random.uniform(kb, (l, d), minval=-0.1, maxval=0.1,
                                dtype=jnp.float32)

    # Config 1: the paper's BN network (bn=True, bias=False, act=None), f32 MXU path.
    out = jax.block_until_ready(mlp_forward(x, weights, act=None, bn=True))
    ref = mlp_reference(x, weights, act=None, bn=True)
    assert out.shape == (B, d)
    err = float(jnp.max(jnp.abs(out - ref)))
    assert jnp.allclose(out, ref, rtol=2e-3, atol=2e-3), (
        f"f32/BN path: max abs err = {err}")

    # Config 2: vanilla tanh network with bias, bf16 MXU path (f32 accumulation).
    out2 = jax.block_until_ready(
        mlp_forward(x, weights, biases, act="tanh", bn=False,
                    compute_dtype=jnp.bfloat16))
    ref2 = mlp_reference(x, weights, biases, act="tanh", bn=False)
    err2 = float(jnp.max(jnp.abs(out2 - ref2)))
    assert err2 < 1e-1, f"bf16/tanh path: max abs err = {err2}"

    print("KERNEL_OK")
</pallas_src>

<mosaic_0001>
module attributes {stable_mosaic.version = 11 : i64} {
  func.func @_mlp_fused_kernel(%arg0: memref<8x128xf32, #tpu.memory_space<vmem>>, %arg1: memref<4x128x128xf32, #tpu.memory_space<vmem>>, %arg2: memref<8x128xf32, #tpu.memory_space<vmem>>) attributes {dimension_semantics = [], scalar_prefetch = 0 : i64, scratch_operands = 0 : i64, tpu.core_type = #tpu.core_type<tc>} {
    %c0 = arith.constant 0 : index
    %c0_0 = arith.constant 0 : index
    %0 = vector.load %arg0[%c0, %c0_0] : memref<8x128xf32, #tpu.memory_space<vmem>>, vector<8x128xf32>
    %c0_i32 = arith.constant 0 : i32
    %1 = arith.index_cast %c0_i32 : i32 to index
    %c0_1 = arith.constant 0 : index
    %c0_2 = arith.constant 0 : index
    %2 = vector.load %arg1[%1, %c0_1, %c0_2] : memref<4x128x128xf32, #tpu.memory_space<vmem>>, vector<1x128x128xf32>
    %3 = vector.shape_cast %2 : vector<1x128x128xf32> to vector<128x128xf32>
    %cst = arith.constant dense<0.000000e+00> : vector<8x128xf32>
    %4 = tpu.matmul %0, %3, %cst {dimension_numbers = #tpu.dot_dimension_numbers<[1], [0], [0], [1], [0, 0, 1, 1], [], []>} : vector<8x128xf32>, vector<128x128xf32>, vector<8x128xf32> -> vector<8x128xf32>
    %5 = arith.mulf %4, %4 : vector<8x128xf32>
    %cst_3 = arith.constant dense<0.000000e+00> : vector<128xf32>
    %6 = vector.multi_reduction <add>, %5, %cst_3 [0] : vector<8x128xf32> to vector<128xf32>
    %7 = vector.shape_cast %6 : vector<128xf32> to vector<1x128xf32>
    %cst_4 = arith.constant 9.99999997E-7 : f32
    %8 = vector.broadcast %cst_4 : f32 to vector<1x128xf32>
    %9 = arith.addf %7, %8 : vector<1x128xf32>
    %cst_5 = arith.constant 3.200000e+01 : f32
    %10 = vector.broadcast %cst_5 : f32 to vector<1x128xf32>
    %11 = arith.mulf %9, %10 : vector<1x128xf32>
    %12 = math.rsqrt %11 : vector<1x128xf32>
    %13 = vector.broadcast %12 : vector<1x128xf32> to vector<8x128xf32>
    %14 = arith.mulf %4, %13 : vector<8x128xf32>
    %c1_i32 = arith.constant 1 : i32
    %15 = arith.index_cast %c1_i32 : i32 to index
    %c0_6 = arith.constant 0 : index
    %c0_7 = arith.constant 0 : index
    %16 = vector.load %arg1[%15, %c0_6, %c0_7] : memref<4x128x128xf32, #tpu.memory_space<vmem>>, vector<1x128x128xf32>
    %17 = vector.shape_cast %16 : vector<1x128x128xf32> to vector<128x128xf32>
    %cst_8 = arith.constant dense<0.000000e+00> : vector<8x128xf32>
    %18 = tpu.matmul %14, %17, %cst_8 {dimension_numbers = #tpu.dot_dimension_numbers<[1], [0], [0], [1], [0, 0, 1, 1], [], []>} : vector<8x128xf32>, vector<128x128xf32>, vector<8x128xf32> -> vector<8x128xf32>
    %19 = arith.mulf %18, %18 : vector<8x128xf32>
    %cst_9 = arith.constant dense<0.000000e+00> : vector<128xf32>
    %20 = vector.multi_reduction <add>, %19, %cst_9 [0] : vector<8x128xf32> to vector<128xf32>
    %21 = vector.shape_cast %20 : vector<128xf32> to vector<1x128xf32>
    %cst_10 = arith.constant 9.99999997E-7 : f32
    %22 = vector.broadcast %cst_10 : f32 to vector<1x128xf32>
    %23 = arith.addf %21, %22 : vector<1x128xf32>
    %cst_11 = arith.constant 3.200000e+01 : f32
    %24 = vector.broadcast %cst_11 : f32 to vector<1x128xf32>
    %25 = arith.mulf %23, %24 : vector<1x128xf32>
    %26 = math.rsqrt %25 : vector<1x128xf32>
    %27 = vector.broadcast %26 : vector<1x128xf32> to vector<8x128xf32>
    %28 = arith.mulf %18, %27 : vector<8x128xf32>
    %c2_i32 = arith.constant 2 : i32
    %29 = arith.index_cast %c2_i32 : i32 to index
    %c0_12 = arith.constant 0 : index
    %c0_13 = arith.constant 0 : index
    %30 = vector.load %arg1[%29, %c0_12, %c0_13] : memref<4x128x128xf32, #tpu.memory_space<vmem>>, vector<1x128x128xf32>
    %31 = vector.shape_cast %30 : vector<1x128x128xf32> to vector<128x128xf32>
    %cst_14 = arith.constant dense<0.000000e+00> : vector<8x128xf32>
    %32 = tpu.matmul %28, %31, %cst_14 {dimension_numbers = #tpu.dot_dimension_numbers<[1], [0], [0], [1], [0, 0, 1, 1], [], []>} : vector<8x128xf32>, vector<128x128xf32>, vector<8x128xf32> -> vector<8x128xf32>
    %33 = arith.mulf %32, %32 : vector<8x128xf32>
    %cst_15 = arith.constant dense<0.000000e+00> : vector<128xf32>
    %34 = vector.multi_reduction <add>, %33, %cst_15 [0] : vector<8x128xf32> to vector<128xf32>
    %35 = vector.shape_cast %34 : vector<128xf32> to vector<1x128xf32>
    %cst_16 = arith.constant 9.99999997E-7 : f32
    %36 = vector.broadcast %cst_16 : f32 to vector<1x128xf32>
    %37 = arith.addf %35, %36 : vector<1x128xf32>
    %cst_17 = arith.constant 3.200000e+01 : f32
    %38 = vector.broadcast %cst_17 : f32 to vector<1x128xf32>
    %39 = arith.mulf %37, %38 : vector<1x128xf32>
    %40 = math.rsqrt %39 : vector<1x128xf32>
    %41 = vector.broadcast %40 : vector<1x128xf32> to vector<8x128xf32>
    %42 = arith.mulf %32, %41 : vector<8x128xf32>
    %c3_i32 = arith.constant 3 : i32
    %43 = arith.index_cast %c3_i32 : i32 to index
    %c0_18 = arith.constant 0 : index
    %c0_19 = arith.constant 0 : index
    %44 = vector.load %arg1[%43, %c0_18, %c0_19] : memref<4x128x128xf32, #tpu.memory_space<vmem>>, vector<1x128x128xf32>
    %45 = vector.shape_cast %44 : vector<1x128x128xf32> to vector<128x128xf32>
    %cst_20 = arith.constant dense<0.000000e+00> : vector<8x128xf32>
    %46 = tpu.matmul %42, %45, %cst_20 {dimension_numbers = #tpu.dot_dimension_numbers<[1], [0], [0], [1], [0, 0, 1, 1], [], []>} : vector<8x128xf32>, vector<128x128xf32>, vector<8x128xf32> -> vector<8x128xf32>
    %47 = arith.mulf %46, %46 : vector<8x128xf32>
    %cst_21 = arith.constant dense<0.000000e+00> : vector<128xf32>
    %48 = vector.multi_reduction <add>, %47, %cst_21 [0] : vector<8x128xf32> to vector<128xf32>
    %49 = vector.shape_cast %48 : vector<128xf32> to vector<1x128xf32>
    %cst_22 = arith.constant 9.99999997E-7 : f32
    %50 = vector.broadcast %cst_22 : f32 to vector<1x128xf32>
    %51 = arith.addf %49, %50 : vector<1x128xf32>
    %cst_23 = arith.constant 3.200000e+01 : f32
    %52 = vector.broadcast %cst_23 : f32 to vector<1x128xf32>
    %53 = arith.mulf %51, %52 : vector<1x128xf32>
    %54 = math.rsqrt %53 : vector<1x128xf32>
    %55 = vector.broadcast %54 : vector<1x128xf32> to vector<8x128xf32>
    %56 = arith.mulf %46, %55 : vector<8x128xf32>
    %c4_i32 = arith.constant 4 : i32
    %c0_24 = arith.constant 0 : index
    %c0_25 = arith.constant 0 : index
    %57 = vector.load %arg2[%c0_24, %c0_25] : memref<8x128xf32, #tpu.memory_space<vmem>>, vector<8x128xf32>
    tpu.vector_store %arg2[%c0_24, %c0_25], %56 {strides = array<i32>} : memref<8x128xf32, #tpu.memory_space<vmem>>, vector<8x128xf32>,
    return
  }
}

</mosaic_0001>

<bundles_post_ra>
// kernel: tpu_custom_call.1
= control target key start
LH: loop header
LB: loop body
LE: loop exit
PB: predicated region body
PF: predicated region fallthrough
CT: control target
= control target key end

     0   :  { %7 = vsyncpa [#allocation3], 0  ;;  %s945_s0 = inlined_call_operand.hbm [shape: f32[8,128], index: 0, kind: input, shape index: {}, may-alias: {0,2}]   ;;  %s946_s1 = inlined_call_operand.hbm [shape: f32[4,128,128], index: 1, kind: input, shape index: {}]   ;;  %s947_s2 = inlined_call_operand.hbm [shape: f32[8,128], index: 2, kind: output, shape index: {}, may-alias: {0,2}]  }
   0x1   :  { %8 = vsyncpa [#allocation6], 0 }
   0x2   :  { %9 = vsyncpa [#allocation4], 0  ;;  %s839_s9 = smov [#allocation2]   ;;  %s840_s11 = smov [#allocation5]  }
   0x3   :  { %s16_s10 = sshll.u32 %s839_s9, 4  ;;  %s25_s12 = sshll.u32 %s840_s11, 4  ;;  %s17_s10 = int_to_ptr.vmem [resolvable:$true] %s16_s10  ;;  %s862_s12 = int_to_ptr.vmem [resolvable:$true] %s25_s12 }
   0x4   :  { %s767_s15 = scalar_lea.hbm %s945_s0, 128 }
   0x5   :  { %p768_p0 = scmp.ne.s32.totalorder %s945_s0, %s767_s15  ;;  %p771_p1 = scmp.lt.u32.totalorder %s767_s15, %s945_s0 }
   0x7   :  { %p773_p2 = pnand %p771_p1, %p768_p0 }
   0x9   :  { %776 = shalt.err (!%p773_p2)
}
   0xa   :  { %s777_s20 = scalar_lea.vmem %s17_s10, 128  ;;  %p782_p4 = scmp.lt.s32.totalorder %s17_s10, %s17_s10 }
   0xb   :  { %p778_p3 = scmp.ne.s32.totalorder %s17_s10, %s777_s20  ;;  %p783_p5 = scmp.lt.s32.totalorder %s777_s20, %s777_s20 }
   0xd   :  { %p784_p6 = por %p783_p5, %p782_p4 }
   0xf   :  { %p785_p7 = pnand %p784_p6, %p778_p3 }
  0x11   :  { %788 = shalt.err (!%p785_p7)
}
  0x12   :  { %19 = dma.hbm_to_vmem [thread:$0]  %s945_s0, 128, %s17_s10, [#allocation3]  }
  0x13   :  { %s789_s25 = scalar_lea.hbm %s946_s1, 8192 }
  0x14   :  { %p790_p8 = scmp.ne.s32.totalorder %s946_s1, %s789_s25  ;;  %p793_p9 = scmp.lt.u32.totalorder %s789_s25, %s946_s1 }
  0x16   :  { %p795_p10 = pnand %p793_p9, %p790_p8 }
  0x18   :  { %798 = shalt.err (!%p795_p10)
}
  0x19   :  { %s799_s30 = scalar_lea.vmem %s862_s12, 8192  ;;  %p804_p12 = scmp.lt.s32.totalorder %s862_s12, %s862_s12 }
  0x1a   :  { %p800_p11 = scmp.ne.s32.totalorder %s862_s12, %s799_s30  ;;  %p805_p13 = scmp.lt.s32.totalorder %s799_s30, %s799_s30 }
  0x1c   :  { %p806_p0 = por %p805_p13, %p804_p12 }
  0x1e   :  { %p807_p1 = pnand %p806_p0, %p800_p11 }
  0x20   :  { %810 = shalt.err (!%p807_p1)
}
  0x21   :  { %s841_s0 = smov 128   ;;  %s842_s3 = smov 8  }
  0x22   :  { %31 = dma.hbm_to_vmem [thread:$0]  %s946_s1, 8192, %s862_s12, [#allocation6], %s841_s0, %s841_s0, %s842_s3  }
  0x23   :  { %833 = dma.done.wait [#allocation3], 128  }
  0x24   :  { %834 = vsyncadd [#allocation3], 4294967168 }
  0x25   :  { %835 = dma.done.wait [#allocation6], 8192  }
  0x26   :  { %836 = vsyncadd [#allocation6], 4294959104  ;;  %v843_v0 = vmov 0.0|0.0   ;;  %vm844_vm0 = vmmov 0   ;;  %v845_v1 = vmov 0.0   ;;  %v39_v2 = vld [vmem:[#allocation5] sm:$0xff] }
  0x27   :  { %655 = vmatprep.subr.bf16.mxu0 %v843_v0  ;;  %547 = vmatprep.mubr.msk.f32.mxu0 %vm844_vm0, %v845_v1  ;;  %v40_v3 = vld [vmem:[#allocation5 + $0x8] sm:$0xff]  ;;  %v41_v4 = vld [vmem:[#allocation5 + $0x10] sm:$0xff]  ;;  %v42_v6 = vld [vmem:[#allocation5 + $0x18] sm:$0xff]  ;;  %s846_s1 = smov [#allocation7]  }
  0x28   :  { %679 = vmatprep.subr.bf16.mxu1 %v843_v0  ;;  %582 = vmatprep.mubr.msk.f32.mxu1 %vm844_vm0, %v845_v1  ;;  %v656_v5 = vpack.c.bf16 %v40_v3, %v39_v2  ;;  %v659_v7 = vpack.c.bf16 %v42_v6, %v41_v4  ;;  %v43_v8 = vld [vmem:[#allocation5 + $0x20] sm:$0xff]  ;;  %v44_v9 = vld [vmem:[#allocation5 + $0x28] sm:$0xff]  ;;  %v45_v11 = vld [vmem:[#allocation5 + $0x30] sm:$0xff]  ;;  %s437_s6 = sshll.u32 %s846_s1, 4  ;;  %s438_s6 = int_to_ptr.vmem [resolvable:$true] %s437_s6 }
  0x29   :  { %v662_v10 = vpack.c.bf16 %v44_v9, %v43_v8  ;;  %v46_v12 = vld [vmem:[#allocation5 + $0x38] sm:$0xff]  ;;  %v47_v14 = vld [vmem:[#allocation5 + $0x40] sm:$0xff]  ;;  %v48_v15 = vld [vmem:[#allocation5 + $0x48] sm:$0xff]  ;;  %s811_s7 = scalar_lea.vmem %s438_s6, 128  ;;  %p816_p3 = scmp.lt.s32.totalorder %s438_s6, %s438_s6 }
  0x2a   :  { %657 = vmatpush3.bf16.msra.mxu0 %v656_v5  ;;  %v665_v13 = vpack.c.bf16 %v46_v12, %v45_v11  ;;  %v668_v16 = vpack.c.bf16 %v48_v15, %v47_v14  ;;  %v49_v17 = vld [vmem:[#allocation5 + $0x50] sm:$0xff]  ;;  %v50_v18 = vld [vmem:[#allocation5 + $0x58] sm:$0xff]  ;;  %v51_v20 = vld [vmem:[#allocation5 + $0x60] sm:$0xff]  ;;  %p812_p2 = scmp.ne.s32.totalorder %s438_s6, %s811_s7  ;;  %p817_p4 = scmp.lt.s32.totalorder %s811_s7, %s811_s7 }
  0x2b   :  { %658 = vmatprep.subr.bf16.mxu0 %v843_v0  ;;  %v671_v19 = vpack.c.bf16 %v50_v18, %v49_v17  ;;  %v52_v21 = vld [vmem:[#allocation5 + $0x68] sm:$0xff]  ;;  %v53_v23 = vld [vmem:[#allocation5 + $0x70] sm:$0xff]  ;;  %v54_v24 = vld [vmem:[#allocation5 + $0x78] sm:$0xff] }
  0x2c   :  { %v674_v22 = vpack.c.bf16 %v52_v21, %v51_v20  ;;  %v677_v25 = vpack.c.bf16 %v54_v24, %v53_v23  ;;  %v38_v26 = vld [vmem:[#allocation2] sm:$0xff]  ;;  %v137_v27 = vld [vmem:[#allocation5 + $0x80] sm:$0xff]  ;;  %v138_v28 = vld [vmem:[#allocation5 + $0x88] sm:$0xff]  ;;  %p818_p5 = por %p817_p4, %p816_p3 }
  0x2d   :  { %v680_v29 = vpack.c.bf16 %v138_v28, %v137_v27  ;;  %v139_v30 = vld [vmem:[#allocation5 + $0x90] sm:$0xff]  ;;  %v140_v31 = vld [vmem:[#allocation5 + $0x98] sm:$0xff]  ;;  %v141_v33 = vld [vmem:[#allocation5 + $0xa0] sm:$0xff] }
  0x2e   :  { %660 = vmatpush3.bf16.msra.mxu0 %v659_v7  ;;  %v683_v32 = vpack.c.bf16 %v140_v31, %v139_v30  ;;  %v142_v34 = vld [vmem:[#allocation5 + $0xa8] sm:$0xff]  ;;  %v143_v36 = vld [vmem:[#allocation5 + $0xb0] sm:$0xff]  ;;  %v144_v37 = vld [vmem:[#allocation5 + $0xb8] sm:$0xff]  ;;  %p819_p6 = pnand %p818_p5, %p812_p2 }
  0x2f   :  { %661 = vmatprep.subr.bf16.mxu0 %v843_v0  ;;  %681 = vmatpush3.bf16.msra.mxu1 %v680_v29  ;;  %v686_v35 = vpack.c.bf16 %v142_v34, %v141_v33  ;;  %v689_v38 = vpack.c.bf16 %v144_v37, %v143_v36  ;;  %v145_v39 = vld [vmem:[#allocation5 + $0xc0] sm:$0xff]  ;;  %v146_v40 = vld [vmem:[#allocation5 + $0xc8] sm:$0xff]  ;;  %v147_v42 = vld [vmem:[#allocation5 + $0xd0] sm:$0xff] }
  0x30   :  { %682 = vmatprep.subr.bf16.mxu1 %v843_v0  ;;  %v692_v41 = vpack.c.bf16 %v146_v40, %v145_v39  ;;  %v148_v43 = vld [vmem:[#allocation5 + $0xd8] sm:$0xff]  ;;  %v149_v45 = vld [vmem:[#allocation5 + $0xe0] sm:$0xff]  ;;  %v150_v46 = vld [vmem:[#allocation5 + $0xe8] sm:$0xff] }
  0x31   :  { %v695_v44 = vpack.c.bf16 %v148_v43, %v147_v42  ;;  %v698_v47 = vpack.c.bf16 %v150_v46, %v149_v45  ;;  %v151_v48 = vld [vmem:[#allocation5 + $0xf0] sm:$0xff]  ;;  %v152_v49 = vld [vmem:[#allocation5 + $0xf8] sm:$0xff]  ;;  %v235_v2 = vld [vmem:[#allocation5 + $0x100] sm:$0xff] }
  0x32   :  { %663 = vmatpush3.bf16.msra.mxu0 %v662_v10  ;;  %v701_v50 = vpack.c.bf16 %v152_v49, %v151_v48  ;;  %v236_v3 = vld [vmem:[#allocation5 + $0x108] sm:$0xff]  ;;  %v237_v5 = vld [vmem:[#allocation5 + $0x110] sm:$0xff]  ;;  %v238_v6 = vld [vmem:[#allocation5 + $0x118] sm:$0xff] }
  0x33   :  { %664 = vmatprep.subr.bf16.mxu0 %v843_v0  ;;  %684 = vmatpush3.bf16.msra.mxu1 %v683_v32  ;;  %v704_v4 = vpack.c.bf16 %v236_v3, %v235_v2  ;;  %v707_v7 = vpack.c.bf16 %v238_v6, %v237_v5  ;;  %v239_v8 = vld [vmem:[#allocation5 + $0x120] sm:$0xff]  ;;  %v240_v9 = vld [vmem:[#allocation5 + $0x128] sm:$0xff]  ;;  %v241_v11 = vld [vmem:[#allocation5 + $0x130] sm:$0xff] }
  0x34   :  { %685 = vmatprep.subr.bf16.mxu1 %v843_v0  ;;  %v710_v10 = vpack.c.bf16 %v240_v9, %v239_v8  ;;  %v244_v14 = vld [vmem:[#allocation5 + $0x148] sm:$0xff]  ;;  %v246_v17 = vld [vmem:[#allocation5 + $0x158] sm:$0xff] }
  0x35   :  { %v248_v20 = vld [vmem:[#allocation5 + $0x168] sm:$0xff]  ;;  %v250_v23 = vld [vmem:[#allocation5 + $0x178] sm:$0xff] }
  0x36   :  { %666 = vmatpush3.bf16.msra.mxu0 %v665_v13  ;;  %v243_v13 = vld [vmem:[#allocation5 + $0x140] sm:$0xff]  ;;  %v334_v39 = vld [vmem:[#allocation5 + $0x188] sm:$0xff]  ;;  %v336_v42 = vld [vmem:[#allocation5 + $0x198] sm:$0xff] }
  0x37   :  { %667 = vmatprep.subr.bf16.mxu0 %v843_v0  ;;  %687 = vmatpush3.bf16.msra.mxu1 %v686_v35  ;;  %v716_v15 = vpack.c.bf16 %v244_v14, %v243_v13  ;;  %v338_v45 = vld [vmem:[#allocation5 + $0x1a8] sm:$0xff]  ;;  %v340_v48 = vld [vmem:[#allocation5 + $0x1b8] sm:$0xff] }
  0x38   :  { %688 = vmatprep.subr.bf16.mxu1 %v843_v0 }
  0x3a   :  { %669 = vmatpush3.bf16.msra.mxu0 %v668_v16  ;;  %v245_v16 = vld [vmem:[#allocation5 + $0x150] sm:$0xff] }
  0x3b   :  { %670 = vmatprep.subr.bf16.mxu0 %v843_v0  ;;  %690 = vmatpush3.bf16.msra.mxu1 %v689_v38  ;;  %v719_v18 = vpack.c.bf16 %v246_v17, %v245_v16  ;;  %v333_v38 = vld [vmem:[#allocation5 + $0x180] sm:$0xff] }
  0x3c   :  { %691 = vmatprep.subr.bf16.mxu1 %v843_v0  ;;  %v728_v40 = vpack.c.bf16 %v334_v39, %v333_v38 }
  0x3e   :  { %672 = vmatpush3.bf16.msra.mxu0 %v671_v19  ;;  %v247_v19 = vld [vmem:[#allocation5 + $0x160] sm:$0xff] }
  0x3f   :  { %673 = vmatprep.subr.bf16.mxu0 %v843_v0  ;;  %693 = vmatpush3.bf16.msra.mxu1 %v692_v41  ;;  %v722_v21 = vpack.c.bf16 %v248_v20, %v247_v19  ;;  %v335_v41 = vld [vmem:[#allocation5 + $0x190] sm:$0xff] }
  0x40   :  { %694 = vmatprep.subr.bf16.mxu1 %v843_v0  ;;  %v731_v43 = vpack.c.bf16 %v336_v42, %v335_v41 }
  0x42   :  { %675 = vmatpush3.bf16.msra.mxu0 %v674_v22  ;;  %v249_v22 = vld [vmem:[#allocation5 + $0x170] sm:$0xff] }
  0x43   :  { %676 = vmatprep.subr.bf16.mxu0 %v843_v0  ;;  %696 = vmatpush3.bf16.msra.mxu1 %v695_v44  ;;  %v725_v24 = vpack.c.bf16 %v250_v23, %v249_v22  ;;  %v337_v44 = vld [vmem:[#allocation5 + $0x1a0] sm:$0xff] }
  0x44   :  { %697 = vmatprep.subr.bf16.mxu1 %v843_v0  ;;  %v734_v46 = vpack.c.bf16 %v338_v45, %v337_v44 }
  0x46   :  { %678 = vmatpush3.bf16.msra.mxu0 %v677_v25 }
  0x47   :  { %703 = vmatprep.subr.bf16.mxu0 %v843_v0  ;;  %699 = vmatpush3.bf16.msra.mxu1 %v698_v47  ;;  %v339_v47 = vld [vmem:[#allocation5 + $0x1b0] sm:$0xff] }
  0x48   :  { %700 = vmatprep.subr.bf16.mxu1 %v843_v0  ;;  %v737_v49 = vpack.c.bf16 %v340_v48, %v339_v47 }
  0x49   :  { %548 = vmatmul.mubr.f32.vlgmr.msra.gmra.mrb[0].mxu0 %v38_v26 }
  0x4a   :  { %617 = vmatprep.mubr.msk.f32.mxu0 %vm844_vm0, %v845_v1  ;;  %705 = vmatpush3.bf16.msra.mxu0 %v704_v4 }
  0x4b   :  { %702 = vmatpush3.bf16.msra.mxu1 %v701_v50  ;;  %706 = vmatprep.subr.bf16.mxu0 %v843_v0  ;;  %v341_v50 = vld [vmem:[#allocation5 + $0x1c0] sm:$0xff] }
  0x4c   :  { %727 = vmatprep.subr.bf16.mxu1 %v843_v0 }
  0x4e   :  { %708 = vmatpush3.bf16.msra.mxu0 %v707_v7 }
  0x4f   :  { %709 = vmatprep.subr.bf16.mxu0 %v843_v0 }
  0x52   :  { %711 = vmatpush3.bf16.msra.mxu0 %v710_v10 }
  0x53   :  { %712 = vmatprep.subr.bf16.mxu0 %v843_v0 }
 0x11c   :  { %v121_v51 = vpop.f32.mrb[0].mxu0 }
 0x11d   :  { %v125_v52 = vmul.f32 %v121_v51, %v121_v51  ;;  %v549_v53 = vpop.f32.mrb[1].mxu0 }
 0x11e   :  { %v343_v53 = vld [vmem:[#allocation5 + $0x1d0] sm:$0xff] }
 0x11f   :  { %v126_v54 = vrot.slane %v125_v52, 4 }
 0x121   :  { %v127_v55 = vadd.f32 %v126_v54, %v125_v52  ;;  %v344_v54 = vld [vmem:[#allocation5 + $0x1d8] sm:$0xff] }
 0x123   :  { %v128_v56 = vrot.slane %v127_v55, 2 }
 0x125   :  { %v129_v57 = vadd.f32 %v128_v56, %v127_v55  ;;  %v743_v55 = vpack.c.bf16 %v344_v54, %v343_v53  ;;  %v345_v56 = vld [vmem:[#allocation5 + $0x1e0] sm:$0xff] }
 0x127   :  { %v130_v58 = vrot.slane %v129_v57, 1 }
 0x129   :  { %v131_v59 = vadd.f32 %v130_v58, %v129_v57  ;;  %v346_v57 = vld [vmem:[#allocation5 + $0x1e8] sm:$0xff] }
 0x12a   :  { %v746_v58 = vpack.c.bf16 %v346_v57, %v345_v56 }
 0x12b   :  { %v132_v60 = vadd.f32 1e-06, %v131_v59  ;;  %v347_v59 = vld [vmem:[#allocation5 + $0x1f0] sm:$0xff] }
 0x12d   :  { %v133_v61 = vmul.f32 32.0, %v132_v60  ;;  %v348_v60 = vld [vmem:[#allocation5 + $0x1f8] sm:$0xff] }
 0x12f   :  { %759 = vrsqrt.f32 %v133_v61  ;;  %v749_v61 = vpack.c.bf16 %v348_v60, %v347_v59 }
 0x139   :  { %v760_v62 = vpop.eup %759 }
 0x13a   :  { %v135_v63 = vmul.f32 %v760_v62, %v121_v51  ;;  %v342_v51 = vld [vmem:[#allocation5 + $0x1c8] sm:$0xff] }
 0x13b   :  { %v740_v52 = vpack.c.bf16 %v342_v51, %v341_v50 }
 0x13c   :  { %583 = vmatmul.mubr.f32.vlgmr.msra.gmra.mrb[0].mxu1 %v135_v63 }
 0x13d   :  { %652 = vmatprep.mubr.msk.f32.mxu1 %vm844_vm0, %v845_v1  ;;  %v242_v1 = vld [vmem:[#allocation5 + $0x138] sm:$0xff]  ;;  %729 = vmatpush3.bf16.msra.mxu1 %v728_v40 }
 0x13e   :  { %v713_v12 = vpack.c.bf16 %v242_v1, %v241_v11  ;;  %730 = vmatprep.subr.bf16.mxu1 %v843_v0 }
 0x140   :  { %714 = vmatpush3.bf16.msra.mxu0 %v713_v12 }
 0x141   :  { %715 = vmatprep.subr.bf16.mxu0 %v843_v0  ;;  %732 = vmatpush3.bf16.msra.mxu1 %v731_v43 }
 0x142   :  { %733 = vmatprep.subr.bf16.mxu1 %v843_v0 }
 0x144   :  { %717 = vmatpush3.bf16.msra.mxu0 %v716_v15 }
 0x145   :  { %718 = vmatprep.subr.bf16.mxu0 %v843_v0  ;;  %735 = vmatpush3.bf16.msra.mxu1 %v734_v46 }
 0x146   :  { %736 = vmatprep.subr.bf16.mxu1 %v843_v0 }
 0x148   :  { %720 = vmatpush3.bf16.msra.mxu0 %v719_v18 }
 0x149   :  { %721 = vmatprep.subr.bf16.mxu0 %v843_v0  ;;  %738 = vmatpush3.bf16.msra.mxu1 %v737_v49 }
 0x14a   :  { %739 = vmatprep.subr.bf16.mxu1 %v843_v0 }
 0x14c   :  { %723 = vmatpush3.bf16.msra.mxu0 %v722_v21 }
 0x14d   :  { %724 = vmatprep.subr.bf16.mxu0 %v843_v0  ;;  %741 = vmatpush3.bf16.msra.mxu1 %v740_v52 }
 0x14e   :  { %742 = vmatprep.subr.bf16.mxu1 %v843_v0 }
 0x150   :  { %726 = vmatpush3.bf16.msra.mxu0 %v725_v24 }
 0x151   :  { %744 = vmatpush3.bf16.msra.mxu1 %v743_v55 }
 0x152   :  { %745 = vmatprep.subr.bf16.mxu1 %v843_v0 }
 0x155   :  { %747 = vmatpush3.bf16.msra.mxu1 %v746_v58 }
 0x156   :  { %748 = vmatprep.subr.bf16.mxu1 %v843_v0 }
 0x159   :  { %750 = vmatpush3.bf16.msra.mxu1 %v749_v61 }
 0x20f   :  { %v219_v25 = vpop.f32.mrb[0].mxu1 }
 0x210   :  { %v223_v26 = vmul.f32 %v219_v25, %v219_v25  ;;  %v584_v27 = vpop.f32.mrb[1].mxu1 }
 0x212   :  { %v224_v28 = vrot.slane %v223_v26, 4 }
 0x214   :  { %v225_v29 = vadd.f32 %v224_v28, %v223_v26 }
 0x216   :  { %v226_v30 = vrot.slane %v225_v29, 2 }
 0x218   :  { %v227_v31 = vadd.f32 %v226_v30, %v225_v29 }
 0x21a   :  { %v228_v32 = vrot.slane %v227_v31, 1 }
 0x21c   :  { %v229_v33 = vadd.f32 %v228_v32, %v227_v31 }
 0x21e   :  { %v230_v34 = vadd.f32 1e-06, %v229_v33 }
 0x220   :  { %v231_v35 = vmul.f32 32.0, %v230_v34 }
 0x222   :  { %761 = vrsqrt.f32 %v231_v35 }
 0x22c   :  { %v762_v36 = vpop.eup %761 }
 0x22d   :  { %v233_v37 = vmul.f32 %v762_v36, %v219_v25 }
 0x22f   :  { %618 = vmatmul.mubr.f32.vlgmr.msra.gmra.mrb[2].mxu0 %v233_v37 }
 0x302   :  { %v317_v62 = vpop.f32.mrb[2].mxu0 }
 0x303   :  { %v321_v63 = vmul.f32 %v317_v62, %v317_v62  ;;  %v619_v2 = vpop.f32.mrb[3].mxu0 }
 0x305   :  { %v322_v3 = vrot.slane %v321_v63, 4 }
 0x307   :  { %v323_v4 = vadd.f32 %v322_v3, %v321_v63 }
 0x309   :  { %v324_v5 = vrot.slane %v323_v4, 2 }
 0x30b   :  { %v325_v6 = vadd.f32 %v324_v5, %v323_v4 }
 0x30d   :  { %v326_v7 = vrot.slane %v325_v6, 1 }
 0x30f   :  { %v327_v8 = vadd.f32 %v326_v7, %v325_v6 }
 0x311   :  { %v328_v9 = vadd.f32 1e-06, %v327_v8 }
 0x313   :  { %v329_v10 = vmul.f32 32.0, %v328_v9 }
 0x315   :  { %763 = vrsqrt.f32 %v329_v10 }
 0x31f   :  { %v764_v11 = vpop.eup %763 }
 0x320   :  { %v331_v1 = vmul.f32 %v764_v11, %v317_v62 }
 0x322   :  { %653 = vmatmul.mubr.f32.vlgmr.msra.gmra.mrb[2].mxu1 %v331_v1 }
 0x3f5   :  { %v415_v0 = vpop.f32.mrb[2].mxu1 }
 0x3f6   :  { %v419_v12 = vmul.f32 %v415_v0, %v415_v0  ;;  %v654_v13 = vpop.f32.mrb[3].mxu1 }
 0x3f8   :  { %v420_v14 = vrot.slane %v419_v12, 4 }
 0x3fa   :  { %v421_v15 = vadd.f32 %v420_v14, %v419_v12 }
 0x3fc   :  { %v422_v16 = vrot.slane %v421_v15, 2 }
 0x3fe   :  { %v423_v17 = vadd.f32 %v422_v16, %v421_v15 }
 0x400   :  { %v424_v18 = vrot.slane %v423_v17, 1 }
 0x402   :  { %v425_v19 = vadd.f32 %v424_v18, %v423_v17 }
 0x404   :  { %v426_v20 = vadd.f32 1e-06, %v425_v19 }
 0x406   :  { %v427_v21 = vmul.f32 32.0, %v426_v20 }
 0x408   :  { %765 = vrsqrt.f32 %v427_v21 }
 0x412   :  { %v766_v22 = vpop.eup %765 }
 0x413   :  { %v429_v23 = vmul.f32 %v766_v22, %v415_v0 }
 0x415   :  { %430 = vst [vmem:[#allocation7] sm:$0xff] %v429_v23 }
 0x416   :  { %822 = shalt.err (!%p819_p6)
}
 0x417   :  { %s823_s10 = scalar_lea.hbm %s947_s2, 128 }
 0x418   :  { %p824_p7 = scmp.ne.s32.totalorder %s947_s2, %s823_s10  ;;  %p827_p8 = scmp.lt.u32.totalorder %s823_s10, %s947_s2 }
 0x41a   :  { %p829_p9 = pnand %p827_p8, %p824_p7 }
 0x41c   :  { %832 = shalt.err (!%p829_p9)
}
 0x41d   :  { %440 = dma.vmem_to_hbm [thread:$0]  %s438_s6, 128, %s947_s2, [#allocation4]  }
 0x41e   :  { %837 = dma.done.wait [#allocation4], 128  }
 0x41f   :  { %838 = vsyncadd [#allocation4], 4294967168 }
 0x420   :  { %444 = vsyncpa [#allocation3], 1 }
 0x421   :  { %445 = vsyncpa [#allocation6], 1 }
 0x422   :  { %446 = vsyncpa [#allocation4], 1 }

</bundles_post_ra>
